<compile_context>
chip_gen: v7x
topology: tpu7x:2x2x1
jax: 0.10.0
libtpu: 0.0.40
codegen_flags: <defaults>
</compile_context>

<pallas_src>
import functools

import jax
import jax.numpy as jnp
from jax.experimental import pallas as pl
from jax.experimental.pallas import tpu as pltpu


def _round_up(v, m):
    return (v + m - 1) // m * m


def _pad_axis(a, axis, new_size):
    """Zero-pad `a` along `axis` up to `new_size` (no-op if already there)."""
    if a.shape[axis] == new_size:
        return a
    pads = [(0, 0)] * a.ndim
    pads[axis] = (0, new_size - a.shape[axis])
    return jnp.pad(a, pads)


def _mlp_fused_kernel(x_ref, w1_ref, b1_ref, w2_ref, b2_ref, o_ref, *,
                      compute_dtype):
    """Grid = (batch_tile, layer).  Activation resides in o_ref across layers.

    layer l:  out = out + ReLU(out @ W1[l] + b1[l]) @ W2[l] + b2[l]
    """
    l = pl.program_id(1)

    @pl.when(l == 0)
    def _init():
        o_ref[...] = x_ref[...]

    cur = o_ref[...]                                   # (TILE_N, Dp) VMEM-resident
    h = jnp.dot(cur.astype(compute_dtype),
                w1_ref[0].astype(compute_dtype),
                preferred_element_type=jnp.float32)
    h = jnp.maximum(h + b1_ref[0], 0.0)                # ReLU(x @ W1 + b1)
    y = jnp.dot(h.astype(compute_dtype),
                w2_ref[0].astype(compute_dtype),
                preferred_element_type=jnp.float32) + b2_ref[0]
    o_ref[...] = (cur.astype(jnp.float32) + y).astype(o_ref.dtype)  # residual


def _pick_tile_n(n, d, h, vmem_budget_bytes=48 * 1024 * 1024):
    """Largest batch tile (multiple of 8, <= 512) whose working set fits VMEM."""
    tile = min(_round_up(max(n, 8), 8), 512)

    def est(t):
        # double-buffered x tile + out tile, hidden intermediate (with slack),
        # double-buffered per-layer weights / biases -- all f32 upper bound.
        return 4 * (2 * t * d + 2 * t * d + 2 * t * h
                    + 2 * (d * h + h * d + h + d))

    while tile > 8 and est(tile) > vmem_budget_bytes:
        tile = max(8, _round_up(tile // 2, 8))
    return tile, est(tile)


def mlp_fused(x, w1_s, b1_s, w2_s, b2_s, *, compute_dtype=jnp.float32):
    """Fused residual-MLP forward.

    x    : (N, D)
    w1_s : (L, D, 4D)   b1_s : (L, 1, 4D)
    w2_s : (L, 4D, D)   b2_s : (L, 1, D)
    """
    n, d = x.shape
    num_layers, _, h = w1_s.shape

    # Lane-dense padding: zero padding is inert for this residual MLP
    # (padded output columns remain exactly zero through every layer).
    d_p = max(_round_up(d, 128), 128)
    h_p = max(_round_up(h, 128), 128)

    tile_n, est_bytes = _pick_tile_n(n, d_p, h_p)
    n_p = _round_up(n, tile_n)

    x_p = _pad_axis(_pad_axis(x, 1, d_p), 0, n_p)
    w1_p = _pad_axis(_pad_axis(w1_s, 1, d_p), 2, h_p)
    b1_p = _pad_axis(b1_s, 2, h_p)
    w2_p = _pad_axis(_pad_axis(w2_s, 1, h_p), 2, d_p)
    b2_p = _pad_axis(b2_s, 2, d_p)

    grid = (n_p // tile_n, num_layers)
    vmem_limit = int(min(max(2 * est_bytes + (16 << 20), 32 << 20), 64 << 20))

    kernel = functools.partial(_mlp_fused_kernel, compute_dtype=compute_dtype)

    out = pl.pallas_call(
        kernel,
        out_shape=jax.ShapeDtypeStruct((n_p, d_p), x.dtype),
        grid_spec=pltpu.PrefetchScalarGridSpec(
            num_scalar_prefetch=0,
            grid=grid,
            in_specs=[
                # activation tile: varies with batch tile, constant over layers
                pl.BlockSpec((tile_n, d_p), lambda i, l: (i, 0)),
                # per-layer weights / biases: streamed along the layer axis
                pl.BlockSpec((1, d_p, h_p), lambda i, l: (l, 0, 0)),
                pl.BlockSpec((1, 1, h_p), lambda i, l: (l, 0, 0)),
                pl.BlockSpec((1, h_p, d_p), lambda i, l: (l, 0, 0)),
                pl.BlockSpec((1, 1, d_p), lambda i, l: (l, 0, 0)),
            ],
            # Same output block across the layer axis -> VMEM-resident
            # accumulator, written back to HBM once per batch tile.
            out_specs=pl.BlockSpec((tile_n, d_p), lambda i, l: (i, 0)),
        ),
        compiler_params=pltpu.CompilerParams(
            dimension_semantics=("parallel", "arbitrary"),
            vmem_limit_bytes=vmem_limit,
        ),
        input_output_aliases={0: 0},  # residual-in-place: x buffer reused
    )(x_p, w1_p, b1_p, w2_p, b2_p)

    if (n_p, d_p) != (n, d):
        out = out[:n, :d]
    return out


def init_mlp_params(key, input_dim, num_layers):
    """nn.Linear-style init (uniform +/- 1/sqrt(fan_in)), stacked over layers."""
    hidden = 4 * input_dim
    w1s, b1s, w2s, b2s = [], [], [], []
    for _ in range(num_layers):
        k1, k2, k3, k4, key = jax.random.split(key, 5)
        lim1 = 1.0 / jnp.sqrt(jnp.float32(input_dim))
        lim2 = 1.0 / jnp.sqrt(jnp.float32(hidden))
        w1s.append(jax.random.uniform(k1, (input_dim, hidden), jnp.float32, -lim1, lim1))
        b1s.append(jax.random.uniform(k2, (1, hidden), jnp.float32, -lim1, lim1))
        w2s.append(jax.random.uniform(k3, (hidden, input_dim), jnp.float32, -lim2, lim2))
        b2s.append(jax.random.uniform(k4, (1, input_dim), jnp.float32, -lim2, lim2))
    return (jnp.stack(w1s), jnp.stack(b1s), jnp.stack(w2s), jnp.stack(b2s))


@jax.jit
def mlp_forward(x, w1_s, b1_s, w2_s, b2_s):
    return mlp_fused(x, w1_s, b1_s, w2_s, b2_s, compute_dtype=jnp.float32)


def _reference_forward(x, w1_s, b1_s, w2_s, b2_s):
    out = x
    for l in range(w1_s.shape[0]):
        hid = jnp.maximum(out @ w1_s[l] + b1_s[l], 0.0)
        out = out + (hid @ w2_s[l] + b2_s[l])
    return out


if __name__ == "__main__":
    # TODO(synk): BatchNorm1d (ln / ln_f) and Dropout(0.0) exist in __init__ but
    # are never applied in forward(), so they are intentionally omitted.
    input_dim = 48     # exercises both the D->128 and H(192)->256 padding paths
    num_layers = 3
    batch = 10         # exercises batch-tile padding (10 -> 16)

    key = jax.random.PRNGKey(0)
    kx, kp = jax.random.split(key)
    x = jax.random.normal(kx, (batch, input_dim), dtype=jnp.float32)
    w1_s, b1_s, w2_s, b2_s = init_mlp_params(kp, input_dim, num_layers)

    out = jax.block_until_ready(mlp_forward(x, w1_s, b1_s, w2_s, b2_s))

    ref = _reference_forward(x, w1_s, b1_s, w2_s, b2_s)
    assert out.shape == (batch, input_dim)
    assert jnp.allclose(out, ref, atol=1e-4, rtol=1e-4), "mismatch vs reference"

    print("KERNEL_OK")
</pallas_src>

<mosaic_0001>
module attributes {stable_mosaic.version = 11 : i64} {
  func.func @_mlp_fused_kernel(%arg0: i32, %arg1: i32, %arg2: memref<16x128xf32, #tpu.memory_space<vmem>>, %arg3: memref<1x128x256xf32, #tpu.memory_space<vmem>>, %arg4: memref<1x1x256xf32, #tpu.memory_space<vmem>>, %arg5: memref<1x256x128xf32, #tpu.memory_space<vmem>>, %arg6: memref<1x1x128xf32, #tpu.memory_space<vmem>>, %arg7: memref<16x128xf32, #tpu.memory_space<vmem>>) attributes {dimension_semantics = [#tpu.dimension_semantics<parallel>, #tpu.dimension_semantics<arbitrary>], iteration_bounds = array<i64: 1, 3>, scalar_prefetch = 0 : i64, scratch_operands = 0 : i64, tpu.core_type = #tpu.core_type<tc>, window_params = [{transform_indices = @transform_0, window_bounds = array<i64: 16, 128>}, {transform_indices = @transform_1, window_bounds = array<i64: 1, 128, 256>}, {transform_indices = @transform_2, window_bounds = array<i64: 1, 1, 256>}, {transform_indices = @transform_3, window_bounds = array<i64: 1, 256, 128>}, {transform_indices = @transform_4, window_bounds = array<i64: 1, 1, 128>}, {transform_indices = @transform_5, window_bounds = array<i64: 16, 128>}]} {
    %c0_i32 = arith.constant 0 : i32
    %0 = arith.cmpi eq, %arg1, %c0_i32 : i32
    %1 = arith.extui %0 : i1 to i32
    %c0_i32_0 = arith.constant 0 : i32
    %2 = arith.cmpi ne, %1, %c0_i32_0 : i32
    scf.if %2 {
      %c0_18 = arith.constant 0 : index
      %c0_19 = arith.constant 0 : index
      %22 = vector.load %arg2[%c0_18, %c0_19] : memref<16x128xf32, #tpu.memory_space<vmem>>, vector<16x128xf32>
      %c0_20 = arith.constant 0 : index
      %c0_21 = arith.constant 0 : index
      %23 = vector.load %arg7[%c0_20, %c0_21] : memref<16x128xf32, #tpu.memory_space<vmem>>, vector<16x128xf32>
      tpu.vector_store %arg7[%c0_20, %c0_21], %22 {strides = array<i32>} : memref<16x128xf32, #tpu.memory_space<vmem>>, vector<16x128xf32>,
    } else {
    }
    %c0 = arith.constant 0 : index
    %c0_1 = arith.constant 0 : index
    %3 = vector.load %arg7[%c0, %c0_1] : memref<16x128xf32, #tpu.memory_space<vmem>>, vector<16x128xf32>
    %c0_2 = arith.constant 0 : index
    %c0_3 = arith.constant 0 : index
    %c0_4 = arith.constant 0 : index
    %4 = vector.load %arg3[%c0_2, %c0_3, %c0_4] : memref<1x128x256xf32, #tpu.memory_space<vmem>>, vector<1x128x256xf32>
    %5 = vector.shape_cast %4 : vector<1x128x256xf32> to vector<128x256xf32>
    %cst = arith.constant dense<0.000000e+00> : vector<16x256xf32>
    %6 = tpu.matmul %3, %5, %cst {dimension_numbers = #tpu.dot_dimension_numbers<[1], [0], [0], [1], [0, 0, 1, 1], [], []>} : vector<16x128xf32>, vector<128x256xf32>, vector<16x256xf32> -> vector<16x256xf32>
    %c0_5 = arith.constant 0 : index
    %c0_6 = arith.constant 0 : index
    %c0_7 = arith.constant 0 : index
    %7 = vector.load %arg4[%c0_5, %c0_6, %c0_7] : memref<1x1x256xf32, #tpu.memory_space<vmem>>, vector<1x1x256xf32>
    %8 = vector.shape_cast %7 : vector<1x1x256xf32> to vector<1x256xf32>
    %9 = vector.broadcast %8 : vector<1x256xf32> to vector<16x256xf32>
    %10 = arith.addf %6, %9 : vector<16x256xf32>
    %cst_8 = arith.constant 0.000000e+00 : f32
    %11 = vector.broadcast %cst_8 : f32 to vector<16x256xf32>
    %12 = arith.maximumf %10, %11 : vector<16x256xf32>
    %c0_9 = arith.constant 0 : index
    %c0_10 = arith.constant 0 : index
    %c0_11 = arith.constant 0 : index
    %13 = vector.load %arg5[%c0_9, %c0_10, %c0_11] : memref<1x256x128xf32, #tpu.memory_space<vmem>>, vector<1x256x128xf32>
    %14 = vector.shape_cast %13 : vector<1x256x128xf32> to vector<256x128xf32>
    %cst_12 = arith.constant dense<0.000000e+00> : vector<16x128xf32>
    %15 = tpu.matmul %12, %14, %cst_12 {dimension_numbers = #tpu.dot_dimension_numbers<[1], [0], [0], [1], [0, 0, 1, 1], [], []>} : vector<16x256xf32>, vector<256x128xf32>, vector<16x128xf32> -> vector<16x128xf32>
    %c0_13 = arith.constant 0 : index
    %c0_14 = arith.constant 0 : index
    %c0_15 = arith.constant 0 : index
    %16 = vector.load %arg6[%c0_13, %c0_14, %c0_15] : memref<1x1x128xf32, #tpu.memory_space<vmem>>, vector<1x1x128xf32>
    %17 = vector.shape_cast %16 : vector<1x1x128xf32> to vector<1x128xf32>
    %18 = vector.broadcast %17 : vector<1x128xf32> to vector<16x128xf32>
    %19 = arith.addf %15, %18 : vector<16x128xf32>
    %20 = arith.addf %3, %19 : vector<16x128xf32>
    %c0_16 = arith.constant 0 : index
    %c0_17 = arith.constant 0 : index
    %21 = vector.load %arg7[%c0_16, %c0_17] : memref<16x128xf32, #tpu.memory_space<vmem>>, vector<16x128xf32>
    tpu.vector_store %arg7[%c0_16, %c0_17], %20 {strides = array<i32>} : memref<16x128xf32, #tpu.memory_space<vmem>>, vector<16x128xf32>,
    return
  }
  func.func @transform_0(%arg0: i32, %arg1: i32) -> (i32, i32) {
    %c0_i32 = arith.constant 0 : i32
    %c0_i32_0 = arith.constant 0 : i32
    return %arg0, %c0_i32 : i32, i32
  }
  func.func @transform_1(%arg0: i32, %arg1: i32) -> (i32, i32, i32) {
    %c0_i32 = arith.constant 0 : i32
    %c0_i32_0 = arith.constant 0 : i32
    %c0_i32_1 = arith.constant 0 : i32
    return %arg1, %c0_i32, %c0_i32_0 : i32, i32, i32
  }
  func.func @transform_2(%arg0: i32, %arg1: i32) -> (i32, i32, i32) {
    %c0_i32 = arith.constant 0 : i32
    %c0_i32_0 = arith.constant 0 : i32
    %c0_i32_1 = arith.constant 0 : i32
    return %arg1, %c0_i32, %c0_i32_0 : i32, i32, i32
  }
  func.func @transform_3(%arg0: i32, %arg1: i32) -> (i32, i32, i32) {
    %c0_i32 = arith.constant 0 : i32
    %c0_i32_0 = arith.constant 0 : i32
    %c0_i32_1 = arith.constant 0 : i32
    return %arg1, %c0_i32, %c0_i32_0 : i32, i32, i32
  }
  func.func @transform_4(%arg0: i32, %arg1: i32) -> (i32, i32, i32) {
    %c0_i32 = arith.constant 0 : i32
    %c0_i32_0 = arith.constant 0 : i32
    %c0_i32_1 = arith.constant 0 : i32
    return %arg1, %c0_i32, %c0_i32_0 : i32, i32, i32
  }
  func.func @transform_5(%arg0: i32, %arg1: i32) -> (i32, i32) {
    %c0_i32 = arith.constant 0 : i32
    %c0_i32_0 = arith.constant 0 : i32
    return %arg0, %c0_i32 : i32, i32
  }
}

</mosaic_0001>

<bundles_post_ra>
// kernel: mlp_forward.1
= control target key start
LH: loop header
LB: loop body
LE: loop exit
PB: predicated region body
PF: predicated region fallthrough
CT: control target
= control target key end

     0   :  { %s874_s18 = smov 0   ;;  %s876_s19 = smov 0   ;;  %s1020_s0 = inlined_call_operand.vmem [shape: f32[16,128], index: 0, kind: input, shape index: {}, may-alias: {0,5}]   ;;  %s1021_s1 = inlined_call_operand.vmem [shape: f32[3,128,256], index: 1, kind: input, shape index: {}]   ;;  %s1022_s2 = inlined_call_operand.vmem [shape: f32[3,1,256], index: 2, kind: input, shape index: {}]   ;;  %s1023_s3 = inlined_call_operand.vmem [shape: f32[3,256,128], index: 3, kind: input, shape index: {}]   ;;  %s1024_s4 = inlined_call_operand.vmem [shape: f32[3,1,128], index: 4, kind: input, shape index: {}]   ;;  %s1025_s5 = inlined_call_operand.vmem [shape: f32[16,128], index: 5, kind: output, shape index: {}, may-alias: {0,5}]  }
   0x1   :  { %s878_s20 = smov 0  }
   0x2 LB: > { %s24_s21 = sadd.s32 1, %s837_s19  ;;  %p678_p0 = scmp.ge.s32.totalorder %s841_s20, 1  ;;  %s841_s20 = sphi %s878_s20, %s15_s20   ;;  %s837_s19 = sphi %s876_s19, %s1027_s19   ;;  %s833_s18 = sphi %s874_s18, %s1026_s18  }
   0x3   : > { %p25_p1 = scmp.ge.s32.totalorder %s24_s21, 3  ;;  %p237_p2 = scmp.lt.s32.totalorder %s841_s20, 4 }
   0x5   : > { %s1029_s21 = smov (%p25_p1, %s24_s21), 0  ;;  %p238_p3 = pnand %p678_p0, %p237_p2 }
   0x6   : > { %p288_p4 = scmp.lt.s32.totalorder (!%p238_p3), %s833_s18, 2  ;;  %p684_p5 = scmp.ne.s32.totalorder (!%p238_p3), %s833_s18, 0 }
   0x7   : > { %241 = sbr.rel (%p238_p3) target bundleno = 499 (0x1f3), region = 40 }
   0xe   : > { %s892_s22 = scalar_select %p288_p4, %s833_s18, 2 }
   0xf   : > { %314 = sbr.rel (%p684_p5) target bundleno = 22 (0x16), region = 44  ;;  %v315_v0 = vld [vmem:[%s1020_s0] sm:$0xff] (!%p684_p5)  ;;  %v316_v1 = vld [vmem:[%s1020_s0 + $0x8] sm:$0xff] (!%p684_p5) }
  0x10   : > { %s690_s23 = sshll.u32 %s892_s22, 8  ;;  %s681_s24 = sshll.u32 %s892_s22, 1  ;;  %317 = vst [vmem:[%s1025_s5] sm:$0xff] (!%p684_p5), %v315_v0  ;;  %318 = vst [vmem:[%s1025_s5 + $0x8] sm:$0xff] (!%p684_p5), %v316_v1 }
  0x11   : > { %s899_s27 = scalar_lea.vmem %s1021_s1, %s690_s23  ;;  %s904_s30 = scalar_lea.vmem %s1022_s2, %s681_s24 }
  0x12   : > { %s909_s8 = scalar_lea.vmem %s1023_s3, %s690_s23  ;;  %s304_s11 = scalar_lea.vmem %s1024_s4, %s892_s22 }
  0x16 PF: > { %v322_v2 = vld [vmem:[%s899_s27 + $0x8] sm:$0xff]  ;;  %v324_v3 = vld [vmem:[%s899_s27 + $0x18] sm:$0xff]  ;;  %v321_v4 = vld [vmem:[%s899_s27] sm:$0xff]  ;;  %v843_v9 = vmov 0.0  }
  0x17   : > { %v730_v5 = vpack.c.bf16 %v324_v3, %v322_v2  ;;  %v323_v6 = vld [vmem:[%s899_s27 + $0x10] sm:$0xff]  ;;  %v326_v7 = vld [vmem:[%s899_s27 + $0x28] sm:$0xff]  ;;  %v328_v8 = vld [vmem:[%s899_s27 + $0x38] sm:$0xff]  ;;  %429 = vmatprep.mubr.f32.mxu0 %v843_v9 }
  0x18   : > { %v732_v10 = vpack.c.bf16 %v323_v6, %v321_v4  ;;  %v734_v11 = vpack.c.bf16 %v328_v8, %v326_v7  ;;  %v325_v12 = vld [vmem:[%s899_s27 + $0x20] sm:$0xff]  ;;  %v327_v13 = vld [vmem:[%s899_s27 + $0x30] sm:$0xff]  ;;  %v330_v14 = vld [vmem:[%s899_s27 + $0x48] sm:$0xff] }
  0x19   : > { %731 = vmatprep.subr.bf16.mxu0 %v730_v5  ;;  %v332_v15 = vld [vmem:[%s899_s27 + $0x58] sm:$0xff]  ;;  %v736_v16 = vpack.c.bf16 %v327_v13, %v325_v12  ;;  %v329_v18 = vld [vmem:[%s899_s27 + $0x40] sm:$0xff]  ;;  %v331_v19 = vld [vmem:[%s899_s27 + $0x50] sm:$0xff] }
  0x1a   : > { %733 = vmatpush1.bf16.msra.mxu0 %v732_v10  ;;  %v738_v17 = vpack.c.bf16 %v332_v15, %v330_v14  ;;  %v334_v20 = vld [vmem:[%s899_s27 + $0x68] sm:$0xff]  ;;  %v336_v21 = vld [vmem:[%s899_s27 + $0x78] sm:$0xff]  ;;  %v740_v22 = vpack.c.bf16 %v331_v19, %v329_v18  ;;  %v333_v24 = vld [vmem:[%s899_s27 + $0x60] sm:$0xff] }
  0x1b   : > { %735 = vmatprep.subr.bf16.mxu0 %v734_v11  ;;  %v742_v23 = vpack.c.bf16 %v336_v21, %v334_v20  ;;  %v335_v25 = vld [vmem:[%s899_s27 + $0x70] sm:$0xff]  ;;  %v338_v26 = vld [vmem:[%s899_s27 + $0x88] sm:$0xff]  ;;  %v340_v27 = vld [vmem:[%s899_s27 + $0x98] sm:$0xff] }
  0x1c   : > { %v337_v28 = vld [vmem:[%s899_s27 + $0x80] sm:$0xff]  ;;  %v339_v29 = vld [vmem:[%s899_s27 + $0x90] sm:$0xff]  ;;  %v463_v31 = vld [vmem:[%s909_s8 + $0x88] sm:$0xff]  ;;  %v744_v32 = vpack.c.bf16 %v335_v25, %v333_v24  ;;  %v746_v38 = vpack.c.bf16 %v340_v27, %v338_v26 }
  0x1d   : > { %v462_v30 = vld [vmem:[%s909_s8 + $0x80] sm:$0xff]  ;;  %v342_v33 = vld [vmem:[%s899_s27 + $0xa8] sm:$0xff]  ;;  %v464_v37 = vld [vmem:[%s909_s8 + $0x90] sm:$0xff]  ;;  %v748_v48 = vpack.c.bf16 %v339_v29, %v337_v28 }
  0x1e   : > { %737 = vmatpush1.bf16.msra.mxu0 %v736_v16  ;;  %v762_v34 = vpack.c.bf16 %v463_v31, %v462_v30  ;;  %v446_v35 = vld [vmem:[%s909_s8] sm:$0xff]  ;;  %v447_v36 = vld [vmem:[%s909_s8 + $0x8] sm:$0xff]  ;;  %v465_v40 = vld [vmem:[%s909_s8 + $0x98] sm:$0xff] }
  0x1f   : > { %739 = vmatprep.subr.bf16.mxu0 %v738_v17  ;;  %v764_v39 = vpack.c.bf16 %v447_v36, %v446_v35  ;;  %v448_v41 = vld [vmem:[%s909_s8 + $0x10] sm:$0xff]  ;;  %v449_v42 = vld [vmem:[%s909_s8 + $0x18] sm:$0xff]  ;;  %v766_v44 = vpack.c.bf16 %v465_v40, %v464_v37  ;;  %v466_v45 = vld [vmem:[%s909_s8 + $0xa0] sm:$0xff] }
  0x20   : > { %v344_v43 = vld [vmem:[%s899_s27 + $0xb8] sm:$0xff]  ;;  %763 = vmatprep.subr.bf16.mxu1 %v762_v34  ;;  %v467_v46 = vld [vmem:[%s909_s8 + $0xa8] sm:$0xff]  ;;  %v768_v47 = vpack.c.bf16 %v449_v42, %v448_v41  ;;  %v341_v49 = vld [vmem:[%s899_s27 + $0xa0] sm:$0xff] }
  0x21   : > { %765 = vmatpush3.bf16.msra.mxu1 %v764_v39  ;;  %v770_v50 = vpack.c.bf16 %v467_v46, %v466_v45  ;;  %v450_v51 = vld [vmem:[%s909_s8 + $0x20] sm:$0xff]  ;;  %v451_v52 = vld [vmem:[%s909_s8 + $0x28] sm:$0xff]  ;;  %v750_v53 = vpack.c.bf16 %v344_v43, %v342_v33  ;;  %v343_v54 = vld [vmem:[%s899_s27 + $0xb0] sm:$0xff] }
  0x22   : > { %741 = vmatpush1.bf16.msra.mxu0 %v740_v22  ;;  %767 = vmatprep.subr.bf16.mxu1 %v766_v44  ;;  %v468_v55 = vld [vmem:[%s909_s8 + $0xb0] sm:$0xff]  ;;  %v469_v56 = vld [vmem:[%s909_s8 + $0xb8] sm:$0xff]  ;;  %v346_v57 = vld [vmem:[%s899_s27 + $0xc8] sm:$0xff]  ;;  %v772_v59 = vpack.c.bf16 %v451_v52, %v450_v51  ;;  %v752_v60 = vpack.c.bf16 %v343_v54, %v341_v49 }
  0x23   : > { %743 = vmatprep.subr.bf16.mxu0 %v742_v23  ;;  %v348_v58 = vld [vmem:[%s899_s27 + $0xd8] sm:$0xff]  ;;  %v345_v61 = vld [vmem:[%s899_s27 + $0xc0] sm:$0xff]  ;;  %v774_v62 = vpack.c.bf16 %v469_v56, %v468_v55  ;;  %v452_v63 = vld [vmem:[%s909_s8 + $0x30] sm:$0xff] }
  0x24   : > { %v453_v0 = vld [vmem:[%s909_s8 + $0x38] sm:$0xff]  ;;  %v754_v1 = vpack.c.bf16 %v348_v58, %v346_v57  ;;  %v347_v2 = vld [vmem:[%s899_s27 + $0xd0] sm:$0xff]  ;;  %v470_v3 = vld [vmem:[%s909_s8 + $0xc0] sm:$0xff] }
  0x25   : > { %769 = vmatpush3.bf16.msra.mxu1 %v768_v47  ;;  %v471_v4 = vld [vmem:[%s909_s8 + $0xc8] sm:$0xff]  ;;  %v352_v6 = vld [vmem:[%s899_s27 + $0xf8] sm:$0xff]  ;;  %v776_v7 = vpack.c.bf16 %v453_v0, %v452_v63  ;;  %v756_v8 = vpack.c.bf16 %v347_v2, %v345_v61  ;;  %v349_v10 = vld [vmem:[%s899_s27 + $0xe0] sm:$0xff] }
  0x26   : > { %745 = vmatpush1.bf16.msra.mxu0 %v744_v32  ;;  %771 = vmatprep.subr.bf16.mxu1 %v770_v50  ;;  %v350_v5 = vld [vmem:[%s899_s27 + $0xe8] sm:$0xff]  ;;  %v778_v11 = vpack.c.bf16 %v471_v4, %v470_v3  ;;  %v454_v12 = vld [vmem:[%s909_s8 + $0x40] sm:$0xff]  ;;  %v351_v15 = vld [vmem:[%s899_s27 + $0xf0] sm:$0xff] }
  0x27   : > { %747 = vmatprep.subr.bf16.mxu0 %v746_v38  ;;  %v455_v13 = vld [vmem:[%s909_s8 + $0x48] sm:$0xff]  ;;  %v758_v14 = vpack.c.bf16 %v352_v6, %v350_v5  ;;  %v472_v16 = vld [vmem:[%s909_s8 + $0xd0] sm:$0xff]  ;;  %v473_v17 = vld [vmem:[%s909_s8 + $0xd8] sm:$0xff]  ;;  %v760_v19 = vpack.c.bf16 %v351_v15, %v349_v10 }
  0x28   : > { %v780_v18 = vpack.c.bf16 %v455_v13, %v454_v12  ;;  %v782_v20 = vpack.c.bf16 %v473_v17, %v472_v16  ;;  %v456_v21 = vld [vmem:[%s909_s8 + $0x50] sm:$0xff]  ;;  %v457_v22 = vld [vmem:[%s909_s8 + $0x58] sm:$0xff]  ;;  %v474_v23 = vld [vmem:[%s909_s8 + $0xe0] sm:$0xff] }
  0x29   : > { %773 = vmatpush3.bf16.msra.mxu1 %v772_v59  ;;  %v475_v24 = vld [vmem:[%s909_s8 + $0xe8] sm:$0xff]  ;;  %v784_v25 = vpack.c.bf16 %v457_v22, %v456_v21  ;;  %v319_v26 = vld [vmem:[%s1025_s5] sm:$0xff]  ;;  %v476_v32 = vld [vmem:[%s909_s8 + $0xf0] sm:$0xff] }
  0x2a   : > { %749 = vmatpush1.bf16.msra.mxu0 %v748_v48  ;;  %775 = vmatprep.subr.bf16.mxu1 %v774_v62  ;;  %v786_v27 = vpack.c.bf16 %v475_v24, %v474_v23  ;;  %v320_v28 = vld [vmem:[%s1025_s5 + $0x8] sm:$0xff]  ;;  %v458_v29 = vld [vmem:[%s909_s8 + $0x60] sm:$0xff]  ;;  %v477_v33 = vld [vmem:[%s909_s8 + $0xf8] sm:$0xff] }
  0x2b   : > { %751 = vmatprep.subr.bf16.mxu0 %v750_v53  ;;  %v459_v30 = vld [vmem:[%s909_s8 + $0x68] sm:$0xff]  ;;  %v790_v34 = vpack.c.bf16 %v477_v33, %v476_v32  ;;  %v460_v35 = vld [vmem:[%s909_s8 + $0x70] sm:$0xff]  ;;  %v461_v36 = vld [vmem:[%s909_s8 + $0x78] sm:$0xff] }
  0x2c   : > { %v788_v31 = vpack.c.bf16 %v459_v30, %v458_v29  ;;  %v792_v37 = vpack.c.bf16 %v461_v36, %v460_v35  ;;  %v353_v40 = vld [vmem:[%s904_s30] sm:$0x3] }
  0x2d   : > { %777 = vmatpush3.bf16.msra.mxu1 %v776_v7  ;;  %v685_v57 = vld [vmem:[%s304_s11] ss:$0 sm:$0xff] }
  0x2e   : > { %753 = vmatpush1.bf16.msra.mxu0 %v752_v60  ;;  %779 = vmatprep.subr.bf16.mxu1 %v778_v11 }
  0x2f   : > { %755 = vmatprep.subr.bf16.mxu0 %v754_v1 }
  0x31   : > { %781 = vmatpush3.bf16.msra.mxu1 %v780_v18 }
  0x32   : > { %757 = vmatpush1.bf16.msra.mxu0 %v756_v8  ;;  %783 = vmatprep.subr.bf16.mxu1 %v782_v20 }
  0x33   : > { %759 = vmatprep.subr.bf16.mxu0 %v758_v14 }
  0x35   : > { %785 = vmatpush3.bf16.msra.mxu1 %v784_v25 }
  0x36   : > { %761 = vmatpush1.bf16.msra.mxu0 %v760_v19  ;;  %787 = vmatprep.subr.bf16.mxu1 %v786_v27 }
  0x39   : > { %430 = vmatmul.mubr.f32.vlgmr.msra.gmra.mrb[0].mxu0 %v319_v26  ;;  %789 = vmatpush3.bf16.msra.mxu1 %v788_v31 }
  0x3a   : > { %435 = vmatprep.mubr.f32.mxu0 %v843_v9  ;;  %791 = vmatprep.subr.bf16.mxu1 %v790_v34  ;;  %v355_v9 = vlaneseq }
  0x3c   : > { %v356_v38 = vshrl.u32 %v355_v9, 7 }
  0x3d   : > { %436 = vmatmul.mubr.f32.gmra.mrb[2].mxu0 %v320_v28  ;;  %793 = vmatpush3.bf16.msra.mxu1 %v792_v37 }
  0x3e   : > { %v357_v39 = vsub.s32 0, %v356_v38  ;;  %v361_v41 = vsub.s32 1, %v356_v38 }
  0x40   : > { %v358_v42 = vrot.slane %v353_v40, %v357_v39  ;;  %v362_v43 = vrot.slane %v353_v40, %v361_v41 }
 0x10c   : > { %v431_v44 = vpop.f32.mrb[0].mxu0 }
 0x10d   : > { %v432_v45 = vadd.f32 %v431_v44, %v358_v42  ;;  %v433_v46 = vpop.f32.mrb[1].mxu0 }
 0x10e   : > { %v434_v47 = vadd.f32 %v433_v46, %v362_v43 }
 0x10f   : > { %v442_v50 = vmax.f32 %v432_v45, 0.0 }
 0x110   : > { %v437_v48 = vpop.f32.mrb[2].mxu0  ;;  %v443_v49 = vmax.f32 %v434_v47, 0.0 }
 0x111   : > { %v438_v51 = vadd.f32 %v437_v48, %v358_v42  ;;  %v439_v52 = vpop.f32.mrb[3].mxu0 }
 0x112   : > { %v440_v53 = vadd.f32 %v439_v52, %v362_v43  ;;  %549 = vmatprep.mubr.f32.mxu1 %v443_v49 }
 0x113   : > { %550 = vmatmul.mubr.f32.vlgmr.msra.gmra.mrb[0].mxu1 %v442_v50  ;;  %v444_v55 = vmax.f32 %v438_v51, 0.0 }
 0x114   : > { %v445_v54 = vmax.f32 %v440_v53, 0.0 }
 0x116   : > { %554 = vmatprep.mubr.f32.mxu1 %v445_v54 }
 0x117   : > { %555 = vmatmul.mubr.f32.gmra.mrb[2].mxu1 %v444_v55 }
 0x1e6   : > { %v724_v56 = vpop.f32.mrb[0].mxu1 }
 0x1e7   : > { %v725_v58 = vpop.f32.mrb[1].mxu1 }
 0x1e8   : > { %v726_v59 = vadd.f32 %v725_v58, %v724_v56 }
 0x1ea   : > { %v552_v60 = vadd.f32 %v726_v59, %v685_v57  ;;  %v727_v61 = vpop.f32.mrb[2].mxu1 }
 0x1eb   : > { %v728_v62 = vpop.f32.mrb[3].mxu1 }
 0x1ec   : > { %v560_v63 = vadd.f32 %v552_v60, %v319_v26  ;;  %v729_v0 = vadd.f32 %v728_v62, %v727_v61 }
 0x1ee   : > { %562 = vst [vmem:[%s1025_s5] sm:$0xff] %v560_v63  ;;  %v557_v1 = vadd.f32 %v729_v0, %v685_v57 }
 0x1f0   : > { %v561_v2 = vadd.f32 %v557_v1, %v320_v28 }
 0x1f2   : > { %563 = vst [vmem:[%s1025_s5 + $0x8] sm:$0xff] %v561_v2 }
 0x1f3 PF: > { %s15_s20 = sadd.s32 1, %s841_s20   ;;  %s1026_s18 = smov %s837_s19 }
 0x1f4   : > { %p12_p6 = scmp.ge.s32.totalorder %s15_s20, 5   ;;  %s1027_s19 = smov %s1029_s21 }
 0x1f6   :  { %14 = sbr.rel (!%p12_p6) target bundleno = 2 (0x2), region = 86 }

</bundles_post_ra>
